<compile_context>
chip_gen: v6e
topology: v6e:2x2x1
jax: 0.10.0
libtpu: 0.0.40
codegen_flags: <defaults>
</compile_context>

<pallas_src>
import math
import functools

import jax
import jax.numpy as jnp
from jax import lax
from jax.experimental import pallas as pl
from jax.experimental.pallas import tpu as pltpu


# ---------------------------------------------------------------------------
# Kernel 1: fused Q/K/V input projections (each token projected exactly once).
# ---------------------------------------------------------------------------
def _qkv_proj_kernel(q_ref, k_ref, v_ref,
                     wq_ref, bq_ref, wk_ref, bk_ref, wv_ref, bv_ref,
                     qo_ref, ko_ref, vo_ref,
                     *, scale, compute_dtype):
    q = q_ref[0]                                                     # (ts, D)
    qp = jnp.dot(q, wq_ref[...], preferred_element_type=jnp.float32) + bq_ref[...]
    qo_ref[0] = (qp * scale).astype(compute_dtype)    # fold 1/sqrt(d_k) into Q

    k = k_ref[0]
    kp = jnp.dot(k, wk_ref[...], preferred_element_type=jnp.float32) + bk_ref[...]
    ko_ref[0] = kp.astype(compute_dtype)

    v = v_ref[0]
    vp = jnp.dot(v, wv_ref[...], preferred_element_type=jnp.float32) + bv_ref[...]
    vo_ref[0] = vp.astype(compute_dtype)


# ---------------------------------------------------------------------------
# Kernel 2: flash attention over projected tiles + fused output projection.
# ---------------------------------------------------------------------------
def _flash_attn_kernel(qp_ref, kp_ref, vp_ref, wo_ref, bo_ref, o_ref,
                       m_s, l_s, acc_s,
                       *, h, head_stride, compute_dtype, approx_recip):
    ki = pl.program_id(2)
    n_kv = pl.num_programs(2)

    # ---- init per (b, qi): reset flash state --------------------------------
    @pl.when(ki == 0)
    def _init():
        m_s[...] = jnp.full(m_s.shape, -jnp.inf, m_s.dtype)
        l_s[...] = jnp.zeros(l_s.shape, l_s.dtype)
        acc_s[...] = jnp.zeros(acc_s.shape, acc_s.dtype)

    # ---- per-head online softmax (h is small & static -> unrolled loop) -----
    for hh in range(h):
        cols = slice(hh * head_stride, (hh + 1) * head_stride)
        qh = qp_ref[0, :, cols]                          # (tq,  head_stride), pre-scaled
        kh = kp_ref[0, :, cols]                          # (tkv, head_stride)
        vh = vp_ref[0, :, cols]

        # scores = qh @ kh^T : contract the head dim of both (no transpose op).
        s = lax.dot_general(qh, kh, (((1,), (1,)), ((), ())),
                            preferred_element_type=jnp.float32)     # (tq, tkv) f32

        m_prev = m_s[hh]                                 # (tq, 128) lane-replicated
        l_prev = l_s[hh]
        m_new = jnp.maximum(m_prev, jnp.max(s, axis=-1, keepdims=True))
        alpha = jnp.exp(m_prev - m_new)                  # (tq, 128)
        p = jnp.exp(s - m_new[:, :1])                    # (tq, tkv) f32

        # In-place per-head updates (only one head's partials live at a time).
        m_s[hh] = m_new
        l_s[hh] = alpha * l_prev + jnp.sum(p, axis=-1, keepdims=True)
        alpha_acc = alpha if head_stride == 128 else alpha[:, :1]
        acc_s[:, cols] = alpha_acc * acc_s[:, cols] + jnp.dot(
            p.astype(compute_dtype), vh, preferred_element_type=jnp.float32)

    # ---- finalize: normalize in place, one output projection, write tile ----
    @pl.when(ki == n_kv - 1)
    def _finalize():
        for hh in range(h):
            cols = slice(hh * head_stride, (hh + 1) * head_stride)
            inv_l = pl.reciprocal(l_s[hh], approx=approx_recip)      # (tq, 128)
            inv_acc = inv_l if head_stride == 128 else inv_l[:, :1]
            acc_s[:, cols] = acc_s[:, cols] * inv_acc
        # Head-contiguous (padded) accumulator IS the merged-heads matrix; the
        # padded rows of wo are zero, so no gather / merge transpose is needed.
        merged = acc_s[...].astype(compute_dtype)                    # (tq, Dp)
        out = jnp.dot(merged, wo_ref[...],
                      preferred_element_type=jnp.float32) + bo_ref[...]
        o_ref[0] = out.astype(o_ref.dtype)


# ---------------------------------------------------------------------------
# Wrapper
# ---------------------------------------------------------------------------
def _pick_tile(s, target, min_mult):
    """Largest sublane-aligned divisor of s that is <= target (or full s)."""
    if s <= target:
        return s                      # full dim -> exempt from (8,128) rule
    best = None
    for t in range(min_mult, target + 1, min_mult):
        if s % t == 0:
            best = t
    if best is not None:
        return best
    # No aligned divisor <= target: fall back to the full (exempt) dim, but
    # refuse pathological block sizes that would blow VMEM.
    assert s <= 4096, (f"sequence length {s} has no tile divisor <= {target} "
                       f"that is a multiple of {min_mult}; pad the sequence")
    return s


def _vmem_capacity_bytes():
    try:
        return int(pltpu.get_tpu_info().vmem_capacity_bytes)
    except Exception:
        return 64 * 2 ** 20           # assume the smallest (v7x per-TC) budget


def multi_headed_attention(query, key, value, params, *, h,
                           compute_dtype=jnp.bfloat16,
                           tq=None, tkv=None, ts=None):
    """Fused MHA forward (eval mode, mask=None).

    params: dict(wq,bq,wk,bk,wv,bv,wo,bo) in PyTorch layout (W:(out,in),
    biases stored as (1, D)).
    """
    B, S, D = query.shape
    assert key.shape == (B, S, D) and value.shape == (B, S, D)
    assert D % h == 0
    d_k = D // h

    cdt = jnp.dtype(compute_dtype)
    exact = cdt == jnp.dtype(jnp.float32)
    csz = cdt.itemsize
    osz = jnp.dtype(query.dtype).itemsize

    # Lane-aligned head layout: each head occupies a 128-lane-aligned group.
    head_stride = 128 * ((d_k + 127) // 128)
    Dp = h * head_stride
    pad = head_stride - d_k

    vmem_cap = _vmem_capacity_bytes()
    big_vmem = vmem_cap >= 100 * 2 ** 20     # v5e/v6e (128 MiB) vs v7x (64 MiB)
    min_mult = 8 if exact else 16

    ts = _pick_tile(S, 256, min_mult) if ts is None else ts
    tq = _pick_tile(S, 128, min_mult) if tq is None else tq
    tkv = _pick_tile(S, 512 if big_vmem else 256, min_mult) if tkv is None else tkv
    assert S % ts == 0 and S % tq == 0 and S % tkv == 0
    n_s, n_q, n_kv = S // ts, S // tq, S // tkv

    def _limit(est):
        return int(min(int(0.85 * vmem_cap), max(2 * est, 8 * 2 ** 20)))

    # ---- one-time parameter prep hoisted out of both kernels ---------------
    # PyTorch Linear computes x @ W.T, so pass W.T.  Zero-pad each head's d_k
    # output columns of Wq/Wk/Wv (and input rows of Wo) to head_stride so the
    # in-kernel per-head slices are 128-lane aligned; the padding contributes
    # exact zeros everywhere, so the math is unchanged.
    def _pad_in_proj(w):                        # (D, D) torch layout -> (D, Dp)
        wt = jnp.asarray(w, jnp.float32).T.reshape(D, h, d_k)
        wt = jnp.pad(wt, ((0, 0), (0, 0), (0, pad)))
        return wt.reshape(D, Dp).astype(cdt)

    def _pad_in_bias(b):                        # (1, D) -> (1, Dp) f32
        bb = jnp.asarray(b, jnp.float32).reshape(1, h, d_k)
        bb = jnp.pad(bb, ((0, 0), (0, 0), (0, pad)))
        return bb.reshape(1, Dp)

    def _pad_out_proj(w):                       # (D, D) torch layout -> (Dp, D)
        wt = jnp.asarray(w, jnp.float32).T.reshape(h, d_k, D)
        wt = jnp.pad(wt, ((0, 0), (0, pad), (0, 0)))
        return wt.reshape(Dp, D).astype(cdt)

    wq_t, wk_t, wv_t = (_pad_in_proj(params[n]) for n in ("wq", "wk", "wv"))
    bq, bk, bv = (_pad_in_bias(params[n]) for n in ("bq", "bk", "bv"))
    wo_t = _pad_out_proj(params["wo"])
    bo = jnp.asarray(params["bo"], jnp.float32).reshape(1, D)

    q_in = query.astype(cdt)
    k_in = key.astype(cdt)
    v_in = value.astype(cdt)

    # ------------------- call 1: Q/K/V projections --------------------------
    x_spec = pl.BlockSpec((1, ts, D), lambda b, si: (b, si, 0))
    wi_spec = pl.BlockSpec((D, Dp), lambda b, si: (0, 0))
    bi_spec = pl.BlockSpec((1, Dp), lambda b, si: (0, 0))
    po_spec = pl.BlockSpec((1, ts, Dp), lambda b, si: (b, si, 0))

    proj_est = (2 * 3 * ts * D * csz                      # q/k/v tiles (x2 buffers)
                + 2 * 3 * D * Dp * csz + 2 * 3 * Dp * 4   # weights + biases
                + 2 * 3 * ts * Dp * csz                   # outputs (x2 buffers)
                + 3 * ts * Dp * 4)                        # f32 transients

    proj_cost = pl.CostEstimate(
        flops=int(6 * B * S * D * Dp),
        transcendentals=0,
        bytes_accessed=int(3 * B * S * D * csz + 3 * D * Dp * csz
                           + 3 * Dp * 4 + 3 * B * S * Dp * csz))

    scale = 1.0 / math.sqrt(d_k)
    qp, kp, vp = pl.pallas_call(
        functools.partial(_qkv_proj_kernel, scale=scale, compute_dtype=cdt),
        out_shape=(jax.ShapeDtypeStruct((B, S, Dp), cdt),
                   jax.ShapeDtypeStruct((B, S, Dp), cdt),
                   jax.ShapeDtypeStruct((B, S, Dp), cdt)),
        grid_spec=pltpu.PrefetchScalarGridSpec(
            num_scalar_prefetch=0,
            grid=(B, n_s),
            in_specs=[x_spec, x_spec, x_spec,
                      wi_spec, bi_spec,     # wq^T (padded), bq
                      wi_spec, bi_spec,     # wk^T (padded), bk
                      wi_spec, bi_spec],    # wv^T (padded), bv
            out_specs=[po_spec, po_spec, po_spec]),
        compiler_params=pltpu.CompilerParams(
            dimension_semantics=("parallel", "parallel"),
            vmem_limit_bytes=_limit(proj_est)),
        cost_estimate=proj_cost,
    )(q_in, k_in, v_in, wq_t, bq, wk_t, bk, wv_t, bv)

    # --------------- call 2: flash attention + output projection ------------
    qv_spec = pl.BlockSpec((1, tq, Dp), lambda b, qi, ki: (b, qi, 0))
    kv_spec = pl.BlockSpec((1, tkv, Dp), lambda b, qi, ki: (b, ki, 0))
    wo_spec = pl.BlockSpec((Dp, D), lambda b, qi, ki: (0, 0))
    bo_spec = pl.BlockSpec((1, D), lambda b, qi, ki: (0, 0))
    o_spec = pl.BlockSpec((1, tq, D), lambda b, qi, ki: (b, qi, 0))

    scratch = [
        pltpu.VMEM((h, tq, 128), jnp.float32),   # per-head running max (lane-dense)
        pltpu.VMEM((h, tq, 128), jnp.float32),   # per-head running softmax denom
        pltpu.VMEM((tq, Dp), jnp.float32),       # un-normalized context accumulator
    ]

    flash_est = (2 * tq * Dp * csz                        # qp tile (x2 buffers)
                 + 2 * 2 * tkv * Dp * csz                 # kp / vp tiles
                 + 2 * Dp * D * csz + 2 * D * 4           # output weight + bias
                 + 2 * tq * D * osz                       # output tile
                 + 2 * h * tq * 128 * 4 + tq * Dp * 4     # scratch
                 + 4 * tq * tkv * 4 + 2 * tq * Dp * 4)    # score / prob transients

    flash_cost = pl.CostEstimate(
        flops=int(4 * B * S * S * Dp + 2 * B * S * Dp * D),
        transcendentals=int(B * h * S * S + B * S * n_kv * h * 128),
        bytes_accessed=int(B * S * Dp * csz               # qp: read once
                           + 2 * n_q * B * S * Dp * csz   # kp/vp: re-read per q-tile
                           + Dp * D * csz + D * 4         # weights
                           + B * S * D * osz))            # output writes

    return pl.pallas_call(
        functools.partial(_flash_attn_kernel, h=h, head_stride=head_stride,
                          compute_dtype=cdt, approx_recip=not exact),
        out_shape=jax.ShapeDtypeStruct((B, S, D), query.dtype),
        grid_spec=pltpu.PrefetchScalarGridSpec(
            num_scalar_prefetch=0,
            grid=(B, n_q, n_kv),
            in_specs=[qv_spec, kv_spec, kv_spec, wo_spec, bo_spec],
            out_specs=o_spec,
            scratch_shapes=scratch),
        compiler_params=pltpu.CompilerParams(
            dimension_semantics=("parallel", "parallel", "arbitrary"),
            vmem_limit_bytes=_limit(flash_est)),
        cost_estimate=flash_cost,
    )(qp, kp, vp, wo_t, bo)


# ---------------------------------------------------------------------------
# Pure-JAX reference mirroring the PyTorch forward (eval mode, mask=None).
# ---------------------------------------------------------------------------
def _reference(query, key, value, params, *, h):
    B, S, D = query.shape
    d_k = D // h

    def lin(x, w, b):
        return x @ w.T + b[0]

    def split(x):
        return x.reshape(B, S, h, d_k).transpose(0, 2, 1, 3)   # (B, h, S, d_k)

    q = split(lin(query, params["wq"], params["bq"]))
    k = split(lin(key, params["wk"], params["bk"]))
    v = split(lin(value, params["wv"], params["bv"]))

    scores = jnp.einsum('bhqd,bhkd->bhqk', q, k) / math.sqrt(d_k)
    p = jax.nn.softmax(scores, axis=-1)
    x = jnp.einsum('bhqk,bhkd->bhqd', p, v)
    x = x.transpose(0, 2, 1, 3).reshape(B, S, D)
    return lin(x, params["wo"], params["bo"])


if __name__ == "__main__":
    B, S, d_model, h = 2, 8, 32, 4

    key0 = jax.random.PRNGKey(0)
    keys = jax.random.split(key0, 16)

    bound = 1.0 / math.sqrt(d_model)

    def u(k, shape):
        return jax.random.uniform(k, shape, jnp.float32, -bound, bound)

    params = {
        "wq": u(keys[0], (d_model, d_model)), "bq": u(keys[1], (1, d_model)),
        "wk": u(keys[2], (d_model, d_model)), "bk": u(keys[3], (1, d_model)),
        "wv": u(keys[4], (d_model, d_model)), "bv": u(keys[5], (1, d_model)),
        "wo": u(keys[6], (d_model, d_model)), "bo": u(keys[7], (1, d_model)),
    }

    query = jax.random.normal(keys[8], (B, S, d_model), jnp.float32)
    key_ = jax.random.normal(keys[9], (B, S, d_model), jnp.float32)
    value = jax.random.normal(keys[10], (B, S, d_model), jnp.float32)

    ref = _reference(query, key_, value, params, h=h)

    # 1) exact-precision path (f32 MXU operands, exact reciprocal)
    out_f32 = multi_headed_attention(query, key_, value, params, h=h,
                                     compute_dtype=jnp.float32)
    out_f32 = jax.block_until_ready(out_f32)
    assert out_f32.shape == (B, S, d_model)
    assert jnp.allclose(out_f32, ref, atol=1e-4, rtol=1e-4), "f32 mismatch vs reference"

    # 2) performance path: bf16 MXU operands, f32 accumulation, EUP reciprocal
    out_bf16 = multi_headed_attention(query, key_, value, params, h=h)
    out_bf16 = jax.block_until_ready(out_bf16)
    assert jnp.allclose(out_bf16, ref, atol=5e-2, rtol=5e-2), "bf16 mismatch vs reference"

    # 3) longer sequence exercising the flash accumulator across kv grid steps
    S2 = 256
    q2 = jax.random.normal(keys[11], (B, S2, d_model), jnp.float32)
    k2 = jax.random.normal(keys[12], (B, S2, d_model), jnp.float32)
    v2 = jax.random.normal(keys[13], (B, S2, d_model), jnp.float32)
    ref2 = _reference(q2, k2, v2, params, h=h)
    out2 = multi_headed_attention(q2, k2, v2, params, h=h,
                                  compute_dtype=jnp.float32, tq=128, tkv=64)
    out2 = jax.block_until_ready(out2)
    assert jnp.allclose(out2, ref2, atol=1e-4, rtol=1e-4), "tiled f32 mismatch vs reference"

    print("KERNEL_OK")
</pallas_src>

<mosaic_0001>
module attributes {stable_mosaic.version = 11 : i64} {
  func.func @_qkv_proj_kernel(%arg0: i32, %arg1: i32, %arg2: memref<1x8x32xf32, #tpu.memory_space<vmem>>, %arg3: memref<1x8x32xf32, #tpu.memory_space<vmem>>, %arg4: memref<1x8x32xf32, #tpu.memory_space<vmem>>, %arg5: memref<32x512xf32, #tpu.memory_space<vmem>>, %arg6: memref<1x512xf32, #tpu.memory_space<vmem>>, %arg7: memref<32x512xf32, #tpu.memory_space<vmem>>, %arg8: memref<1x512xf32, #tpu.memory_space<vmem>>, %arg9: memref<32x512xf32, #tpu.memory_space<vmem>>, %arg10: memref<1x512xf32, #tpu.memory_space<vmem>>, %arg11: memref<1x8x512xf32, #tpu.memory_space<vmem>>, %arg12: memref<1x8x512xf32, #tpu.memory_space<vmem>>, %arg13: memref<1x8x512xf32, #tpu.memory_space<vmem>>) attributes {dimension_semantics = [#tpu.dimension_semantics<parallel>, #tpu.dimension_semantics<parallel>], iteration_bounds = array<i64: 2, 1>, scalar_prefetch = 0 : i64, scratch_operands = 0 : i64, tpu.core_type = #tpu.core_type<tc>, window_params = [{transform_indices = @transform_0, window_bounds = array<i64: 1, 8, 32>}, {transform_indices = @transform_1, window_bounds = array<i64: 1, 8, 32>}, {transform_indices = @transform_2, window_bounds = array<i64: 1, 8, 32>}, {pipeline_mode = #tpu.pipeline_mode<synchronous>, transform_indices = @transform_3, window_bounds = array<i64: 32, 512>}, {pipeline_mode = #tpu.pipeline_mode<synchronous>, transform_indices = @transform_4, window_bounds = array<i64: 1, 512>}, {pipeline_mode = #tpu.pipeline_mode<synchronous>, transform_indices = @transform_5, window_bounds = array<i64: 32, 512>}, {pipeline_mode = #tpu.pipeline_mode<synchronous>, transform_indices = @transform_6, window_bounds = array<i64: 1, 512>}, {pipeline_mode = #tpu.pipeline_mode<synchronous>, transform_indices = @transform_7, window_bounds = array<i64: 32, 512>}, {pipeline_mode = #tpu.pipeline_mode<synchronous>, transform_indices = @transform_8, window_bounds = array<i64: 1, 512>}, {transform_indices = @transform_9, window_bounds = array<i64: 1, 8, 512>}, {transform_indices = @transform_10, window_bounds = array<i64: 1, 8, 512>}, {transform_indices = @transform_11, window_bounds = array<i64: 1, 8, 512>}]} {
    %c0 = arith.constant 0 : index
    %c0_0 = arith.constant 0 : index
    %c0_1 = arith.constant 0 : index
    %0 = vector.load %arg2[%c0, %c0_0, %c0_1] : memref<1x8x32xf32, #tpu.memory_space<vmem>>, vector<1x8x32xf32>
    %1 = vector.shape_cast %0 : vector<1x8x32xf32> to vector<8x32xf32>
    %c0_2 = arith.constant 0 : index
    %c0_3 = arith.constant 0 : index
    %2 = vector.load %arg5[%c0_2, %c0_3] : memref<32x512xf32, #tpu.memory_space<vmem>>, vector<32x512xf32>
    %cst = arith.constant dense<0.000000e+00> : vector<8x512xf32>
    %3 = tpu.matmul %1, %2, %cst {dimension_numbers = #tpu.dot_dimension_numbers<[1], [0], [0], [1], [0, 0, 1, 1], [], []>} : vector<8x32xf32>, vector<32x512xf32>, vector<8x512xf32> -> vector<8x512xf32>
    %c0_4 = arith.constant 0 : index
    %c0_5 = arith.constant 0 : index
    %4 = vector.load %arg6[%c0_4, %c0_5] : memref<1x512xf32, #tpu.memory_space<vmem>>, vector<1x512xf32>
    %5 = vector.broadcast %4 : vector<1x512xf32> to vector<8x512xf32>
    %6 = arith.addf %3, %5 : vector<8x512xf32>
    %cst_6 = arith.constant 0.353553385 : f32
    %7 = vector.broadcast %cst_6 : f32 to vector<8x512xf32>
    %8 = arith.mulf %6, %7 : vector<8x512xf32>
    %c0_7 = arith.constant 0 : index
    %c0_8 = arith.constant 0 : index
    %c0_9 = arith.constant 0 : index
    %9 = vector.load %arg11[%c0_7, %c0_8, %c0_9] : memref<1x8x512xf32, #tpu.memory_space<vmem>>, vector<1x8x512xf32>
    %10 = vector.shape_cast %9 : vector<1x8x512xf32> to vector<8x512xf32>
    %11 = vector.shape_cast %8 : vector<8x512xf32> to vector<1x8x512xf32>
    tpu.vector_store %arg11[%c0_7, %c0_8, %c0_9], %11 {strides = array<i32>} : memref<1x8x512xf32, #tpu.memory_space<vmem>>, vector<1x8x512xf32>,
    %c0_10 = arith.constant 0 : index
    %c0_11 = arith.constant 0 : index
    %c0_12 = arith.constant 0 : index
    %12 = vector.load %arg3[%c0_10, %c0_11, %c0_12] : memref<1x8x32xf32, #tpu.memory_space<vmem>>, vector<1x8x32xf32>
    %13 = vector.shape_cast %12 : vector<1x8x32xf32> to vector<8x32xf32>
    %c0_13 = arith.constant 0 : index
    %c0_14 = arith.constant 0 : index
    %14 = vector.load %arg7[%c0_13, %c0_14] : memref<32x512xf32, #tpu.memory_space<vmem>>, vector<32x512xf32>
    %cst_15 = arith.constant dense<0.000000e+00> : vector<8x512xf32>
    %15 = tpu.matmul %13, %14, %cst_15 {dimension_numbers = #tpu.dot_dimension_numbers<[1], [0], [0], [1], [0, 0, 1, 1], [], []>} : vector<8x32xf32>, vector<32x512xf32>, vector<8x512xf32> -> vector<8x512xf32>
    %c0_16 = arith.constant 0 : index
    %c0_17 = arith.constant 0 : index
    %16 = vector.load %arg8[%c0_16, %c0_17] : memref<1x512xf32, #tpu.memory_space<vmem>>, vector<1x512xf32>
    %17 = vector.broadcast %16 : vector<1x512xf32> to vector<8x512xf32>
    %18 = arith.addf %15, %17 : vector<8x512xf32>
    %c0_18 = arith.constant 0 : index
    %c0_19 = arith.constant 0 : index
    %c0_20 = arith.constant 0 : index
    %19 = vector.load %arg12[%c0_18, %c0_19, %c0_20] : memref<1x8x512xf32, #tpu.memory_space<vmem>>, vector<1x8x512xf32>
    %20 = vector.shape_cast %19 : vector<1x8x512xf32> to vector<8x512xf32>
    %21 = vector.shape_cast %18 : vector<8x512xf32> to vector<1x8x512xf32>
    tpu.vector_store %arg12[%c0_18, %c0_19, %c0_20], %21 {strides = array<i32>} : memref<1x8x512xf32, #tpu.memory_space<vmem>>, vector<1x8x512xf32>,
    %c0_21 = arith.constant 0 : index
    %c0_22 = arith.constant 0 : index
    %c0_23 = arith.constant 0 : index
    %22 = vector.load %arg4[%c0_21, %c0_22, %c0_23] : memref<1x8x32xf32, #tpu.memory_space<vmem>>, vector<1x8x32xf32>
    %23 = vector.shape_cast %22 : vector<1x8x32xf32> to vector<8x32xf32>
    %c0_24 = arith.constant 0 : index
    %c0_25 = arith.constant 0 : index
    %24 = vector.load %arg9[%c0_24, %c0_25] : memref<32x512xf32, #tpu.memory_space<vmem>>, vector<32x512xf32>
    %cst_26 = arith.constant dense<0.000000e+00> : vector<8x512xf32>
    %25 = tpu.matmul %23, %24, %cst_26 {dimension_numbers = #tpu.dot_dimension_numbers<[1], [0], [0], [1], [0, 0, 1, 1], [], []>} : vector<8x32xf32>, vector<32x512xf32>, vector<8x512xf32> -> vector<8x512xf32>
    %c0_27 = arith.constant 0 : index
    %c0_28 = arith.constant 0 : index
    %26 = vector.load %arg10[%c0_27, %c0_28] : memref<1x512xf32, #tpu.memory_space<vmem>>, vector<1x512xf32>
    %27 = vector.broadcast %26 : vector<1x512xf32> to vector<8x512xf32>
    %28 = arith.addf %25, %27 : vector<8x512xf32>
    %c0_29 = arith.constant 0 : index
    %c0_30 = arith.constant 0 : index
    %c0_31 = arith.constant 0 : index
    %29 = vector.load %arg13[%c0_29, %c0_30, %c0_31] : memref<1x8x512xf32, #tpu.memory_space<vmem>>, vector<1x8x512xf32>
    %30 = vector.shape_cast %29 : vector<1x8x512xf32> to vector<8x512xf32>
    %31 = vector.shape_cast %28 : vector<8x512xf32> to vector<1x8x512xf32>
    tpu.vector_store %arg13[%c0_29, %c0_30, %c0_31], %31 {strides = array<i32>} : memref<1x8x512xf32, #tpu.memory_space<vmem>>, vector<1x8x512xf32>,
    return
  }
  func.func @transform_0(%arg0: i32, %arg1: i32) -> (i32, i32, i32) {
    %c0_i32 = arith.constant 0 : i32
    %c0_i32_0 = arith.constant 0 : i32
    return %arg0, %arg1, %c0_i32 : i32, i32, i32
  }
  func.func @transform_1(%arg0: i32, %arg1: i32) -> (i32, i32, i32) {
    %c0_i32 = arith.constant 0 : i32
    %c0_i32_0 = arith.constant 0 : i32
    return %arg0, %arg1, %c0_i32 : i32, i32, i32
  }
  func.func @transform_2(%arg0: i32, %arg1: i32) -> (i32, i32, i32) {
    %c0_i32 = arith.constant 0 : i32
    %c0_i32_0 = arith.constant 0 : i32
    return %arg0, %arg1, %c0_i32 : i32, i32, i32
  }
  func.func @transform_3(%arg0: i32, %arg1: i32) -> (i32, i32) {
    %c0_i32 = arith.constant 0 : i32
    %c0_i32_0 = arith.constant 0 : i32
    %c0_i32_1 = arith.constant 0 : i32
    return %c0_i32, %c0_i32_0 : i32, i32
  }
  func.func @transform_4(%arg0: i32, %arg1: i32) -> (i32, i32) {
    %c0_i32 = arith.constant 0 : i32
    %c0_i32_0 = arith.constant 0 : i32
    %c0_i32_1 = arith.constant 0 : i32
    return %c0_i32, %c0_i32_0 : i32, i32
  }
  func.func @transform_5(%arg0: i32, %arg1: i32) -> (i32, i32) {
    %c0_i32 = arith.constant 0 : i32
    %c0_i32_0 = arith.constant 0 : i32
    %c0_i32_1 = arith.constant 0 : i32
    return %c0_i32, %c0_i32_0 : i32, i32
  }
  func.func @transform_6(%arg0: i32, %arg1: i32) -> (i32, i32) {
    %c0_i32 = arith.constant 0 : i32
    %c0_i32_0 = arith.constant 0 : i32
    %c0_i32_1 = arith.constant 0 : i32
    return %c0_i32, %c0_i32_0 : i32, i32
  }
  func.func @transform_7(%arg0: i32, %arg1: i32) -> (i32, i32) {
    %c0_i32 = arith.constant 0 : i32
    %c0_i32_0 = arith.constant 0 : i32
    %c0_i32_1 = arith.constant 0 : i32
    return %c0_i32, %c0_i32_0 : i32, i32
  }
  func.func @transform_8(%arg0: i32, %arg1: i32) -> (i32, i32) {
    %c0_i32 = arith.constant 0 : i32
    %c0_i32_0 = arith.constant 0 : i32
    %c0_i32_1 = arith.constant 0 : i32
    return %c0_i32, %c0_i32_0 : i32, i32
  }
  func.func @transform_9(%arg0: i32, %arg1: i32) -> (i32, i32, i32) {
    %c0_i32 = arith.constant 0 : i32
    %c0_i32_0 = arith.constant 0 : i32
    return %arg0, %arg1, %c0_i32 : i32, i32, i32
  }
  func.func @transform_10(%arg0: i32, %arg1: i32) -> (i32, i32, i32) {
    %c0_i32 = arith.constant 0 : i32
    %c0_i32_0 = arith.constant 0 : i32
    return %arg0, %arg1, %c0_i32 : i32, i32, i32
  }
  func.func @transform_11(%arg0: i32, %arg1: i32) -> (i32, i32, i32) {
    %c0_i32 = arith.constant 0 : i32
    %c0_i32_0 = arith.constant 0 : i32
    return %arg0, %arg1, %c0_i32 : i32, i32, i32
  }
}

</mosaic_0001>

<bundles_post_ra>
// kernel: tpu_custom_call.1
= control target key start
LH: loop header
LB: loop body
LE: loop exit
PB: predicated region body
PF: predicated region fallthrough
CT: control target
= control target key end

     0   :  { %s2323_s0 = inlined_call_operand.hbm [shape: f32[2,8,32], index: 0, kind: input, shape index: {}]   ;;  %s2324_s1 = inlined_call_operand.hbm [shape: f32[2,8,32], index: 1, kind: input, shape index: {}]   ;;  %s2325_s2 = inlined_call_operand.hbm [shape: f32[2,8,32], index: 2, kind: input, shape index: {}]   ;;  %s2326_s3 = inlined_call_operand.hbm [shape: f32[32,512], index: 3, kind: input, shape index: {}]   ;;  %s2327_s4 = inlined_call_operand.vmem [shape: f32[1,512], index: 4, kind: input, shape index: {}]   ;;  %s2328_s5 = inlined_call_operand.hbm [shape: f32[32,512], index: 5, kind: input, shape index: {}]   ;;  %s2329_s6 = inlined_call_operand.vmem [shape: f32[1,512], index: 6, kind: input, shape index: {}]   ;;  %s2330_s7 = inlined_call_operand.hbm [shape: f32[32,512], index: 7, kind: input, shape index: {}]   ;;  %s2331_s8 = inlined_call_operand.vmem [shape: f32[1,512], index: 8, kind: input, shape index: {}]   ;;  %s2332_s9 = inlined_call_operand.hbm [shape: f32[2,8,512], index: 9, kind: output, shape index: {0}]   ;;  %s2333_s10 = inlined_call_operand.hbm [shape: f32[2,8,512], index: 10, kind: output, shape index: {1}]   ;;  %s2334_s11 = inlined_call_operand.hbm [shape: f32[2,8,512], index: 11, kind: output, shape index: {2}]  }
   0x1   :  { %2355 = sst [smem:[#allocation29_spill]] %s2324_s1 }
   0x2   :  { %2356 = sst [smem:[#allocation30_spill]] %s2326_s3 }
   0x3   :  { %2357 = sst [smem:[#allocation31_spill]] %s2328_s5 }
   0x4   :  { %2358 = sst [smem:[#allocation32_spill]] %s2331_s8 }
   0x5   :  { %2359 = sst [smem:[#allocation33_spill]] %s2333_s10 }
   0x6   :  { %2360 = sst [smem:[#allocation34_spill]] %s2334_s11 }
   0x7   :  { %17 = vsyncpa [#allocation3], 0 }
   0x8   :  { %19 = vsyncpa [#allocation3 + $0x1], 0 }
   0x9   :  { %20 = vsyncpa [#allocation6], 0 }
   0xa   :  { %22 = vsyncpa [#allocation6 + $0x1], 0 }
   0xb   :  { %23 = vsyncpa [#allocation9], 0 }
   0xc   :  { %24 = vsyncpa [#allocation12], 0 }
   0xd   :  { %25 = vsyncpa [#allocation4], 0 }
   0xe   :  { %27 = vsyncpa [#allocation4 + $0x1], 0 }
   0xf   :  { %28 = vsyncpa [#allocation15], 0 }
  0x10   :  { %30 = vsyncpa [#allocation15 + $0x1], 0  ;;  %s1956_s17 = smov 0   ;;  %s1958_s18 = smov 0  }
  0x11   :  { %s1960_s19 = smov 0   ;;  %s1962_s20 = smov 0  }
  0x12   :  { %s1964_s21 = smov 0   ;;  %s1966_s22 = smov 0  }
  0x13 LB: > { %2361 = sst [smem:[#allocation23_spill]] %s1862_s17  ;;  %s1987_s23 = sadd.s32 4294967295, %s1882_s22   ;;  %s1882_s22 = sphi %s1966_s22, %s36_s22   ;;  %s1878_s21 = sphi %s1964_s21, %s2403_s21   ;;  %s1874_s20 = sphi %s1962_s20, %s2402_s20   ;;  %s1870_s19 = sphi %s1960_s19, %s2406_s19   ;;  %s1866_s18 = sphi %s1958_s18, %s2405_s18   ;;  %s1862_s17 = sphi %s1956_s17, %s2404_s17  }
  0x14   : > { %2362 = sst [smem:[#allocation24_spill]] %s1878_s21  ;;  %s2335_s24 = sadd.s32 4294967294, %s1882_s22  }
  0x15   : > { %2363 = sst [smem:[#allocation25_spill]] %s1882_s22  ;;  %p70_p0 = scmp.ne.s32.totalorder %s1866_s18, %s1862_s17 }
  0x16   : > { %p2349_p1 = scmp.eq.s32.totalorder %s1987_s23, 0  ;;  %p284_p3 = scmp.eq.s32.totalorder %s2335_s24, 1 }
  0x17   : > { %p1415_p5 = scmp.ge.s32.totalorder %s1882_s22, 1  ;;  %p347_p7 = scmp.lt.s32.totalorder %s1882_s22, 3 }
  0x18   : > { %p1998_p4 = por %p2349_p1, %p70_p0  ;;  %p2003_p6 = por %p284_p3, %p70_p0 }
  0x19   : > { %p2008_p8 = pnand %p1415_p5, %p347_p7  ;;  %s1884_s28 = smov [#allocation8]  }
  0x1a   : > { %s2364_s25 = scalar_select %p1998_p4, 1, 0 }
  0x1b   : > { %s2365_s26 = scalar_select %p2003_p6, 1, 0 }
  0x1c   : > { %s2367_s27 = scalar_select %p2008_p8, 1, 0 }
  0x1d   : > { %2366 = sst [smem:[#allocation26_spill]] %s2365_s26  ;;  %s359_s29 = sshll.u32 %s1884_s28, 4  ;;  %s360_s29 = int_to_ptr.vmem [resolvable:$true] %s359_s29 }
  0x1e   : > { %p1480_p9 = pneg %p2008_p8  ;;  %s48_s12 = sadd.s32 1, %s1878_s21 }
  0x1f   : > { %s1583_s13 = scalar_lea.vmem %s360_s29, 2048  ;;  %p1591_p5 = scmp.lt.s32.totalorder %s360_s29, %s360_s29 }
  0x20   : > { %p2017_p11 = pnand %p1480_p9, %p2349_p1  ;;  %p1584_p13 = scmp.ne.s32.totalorder %s360_s29, %s1583_s13 }
  0x21   : > { %p1592_p7 = scmp.lt.s32.totalorder %s1583_s13, %s1583_s13 }
  0x22   : > { %p2350_p12 = pneg %p2017_p11 }
  0x23   : > { %p1593_p2 = por %p1592_p7, %p1591_p5 }
  0x24   : > { %p1586_p0 = pnand %p1584_p13, %p2350_p12 }
  0x26   : > { %p1587_p3 = pneg %p1586_p0 }
  0x28   : > { %p1594_p10 = pnand %p1593_p2, %p1587_p3 }
  0x2a   : > { %1597 = shalt.err (!%p1594_p10)
}
  0x2b   : > { %s2338_s14 = smov 512   ;;  %s2340_s15 = smov 32  }
  0x2c   : > { %s2369_s3 = sld [smem:[#allocation30_spill]]  ;;  %p50_p2 = scmp.ge.s32.totalorder %s48_s12, 2 }
  0x2d   : > { %s57_s13 = sadd.s32 1, %s1870_s19  ;;  %p64_p9 = scmp.ne.s32.totalorder %s1870_s19, %s1866_s18 }
  0x2e   : > { %p65_p10 = scmp.eq.s32.totalorder %s1882_s22, 0  ;;  %s2408_s12 = smov (%p50_p2, %s48_s12), 0 }
  0x2f   : > { %2370 = sst [smem:[#allocation27_spill]] %s2408_s12  ;;  %p2371_p0 = scmp.eq.s32.totalorder %s1987_s23, 1 }
  0x30   : > { %p66_p13 = por %p65_p10, %p64_p9  ;;  %s52_s26 = ssub.s32 %s1878_s21, %s2408_s12 }
  0x31   : > { %p2043_p3 = por %p2371_p0, %p64_p9  ;;  %p1513_p5 = scmp.lt.s32.totalorder %s1882_s22, 2 }
  0x32   : > { %1483 = dma.hbm_to_vmem [thread:$0]  (!%p2017_p11), %s2369_s3, 2048, %s360_s29, [#allocation9], %s2338_s14, %s2338_s14, %s2340_s15  }
  0x33   : > { %s2372_s24 = scalar_select %p2043_p3, 1, 0 }
  0x34   : > { %p55_p7 = scmp.eq.s32.totalorder %s52_s26, 0  ;;  %s2344_s17 = sand.u32 1, %s1870_s19  }
  0x35   : > { %s2053_s29 = sshll.u32 %s2344_s17, 3  ;;  %s2056_s16 = sshll.u32 %s1878_s21, 7 }
  0x36   : > { %s2059_s28 = scalar_select %p55_p7, %s1870_s19, %s57_s13  }
  0x37   : > { %p2061_p2 = pnand %p1513_p5, %p66_p13  ;;  %s427_s15 = sand.u32 1, %s1882_s22  }
  0x38   : > { %2373 = sst [smem:[#allocation28_spill]] %s2059_s28  ;;  %s431_s11 = scalar_lea.vmem [#allocation5], %s2053_s29 }
  0x39   : > { %s2375_s1 = sld [smem:[#allocation29_spill]]  ;;  %s439_s17 = sshll.u32 %s431_s11, 4  ;;  %s440_s17 = int_to_ptr.vmem [resolvable:$true] %s439_s17 }
  0x3a   : > { %s1887_s8 = smov [#allocation10]   ;;  %s2071_s10 = scalar_lea.sflag [#allocation6], %s427_s15 }
  0x3b   : > { %s375_s21 = sshll.u32 %s1887_s8, 4  ;;  %p2351_p9 = pneg %p2061_p2  ;;  %s376_s21 = int_to_ptr.vmem [resolvable:$true] %s375_s21 }
  0x3c   : > { %s1611_s13 = scalar_lea.vmem %s440_s17, 128  ;;  %s1888_s28 = smov [#allocation5]  }
  0x3d   : > { %p1612_p10 = scmp.ne.s32.totalorder %s440_s17, %s1611_s13  ;;  %s1616_s22 = sshll.u32 %s1888_s28, 4  ;;  %s1617_s22 = int_to_ptr.vmem [resolvable:$false] %s1616_s22 }
  0x3e   : > { %s1618_s3 = scalar_lea.vmem %s1617_s22, 256  ;;  %p1619_p5 = scmp.lt.s32.totalorder %s440_s17, %s1617_s22 }
  0x3f   : > { %s437_s26 = scalar_lea.hbm %s2375_s1, %s2056_s16  ;;  %p1614_p13 = pnand %p1612_p10, %p2351_p9 }
  0x40   : > { %p1620_p7 = scmp.lt.s32.totalorder %s1618_s3, %s1611_s13 }
  0x41   : > { %p1615_p0 = pneg %p1614_p13 }
  0x42   : > { %p1621_p1 = por %p1620_p7, %p1619_p5 }
  0x44   : > { %p1622_p12 = pnand %p1621_p1, %p1615_p0 }
  0x46   : > { %1625 = shalt.err (!%p1622_p12)
}
  0x47   : > { %1496 = dma.hbm_to_vmem [thread:$0]  (!%p2061_p2), %s437_s26, 128, %s440_s17, %s2071_s10  }
  0x48   : > { %s1637_s8 = scalar_lea.vmem %s376_s21, 2048  ;;  %p2376_p10 = pneg %p2017_p11 }
  0x49   : > { %p1638_p6 = scmp.ne.s32.totalorder %s376_s21, %s1637_s8  ;;  %p1645_p3 = scmp.lt.s32.totalorder %s376_s21, %s376_s21 }
  0x4a   : > { %p1646_p4 = scmp.lt.s32.totalorder %s1637_s8, %s1637_s8 }
  0x4b   : > { %p1640_p13 = pnand %p1638_p6, %p2376_p10 }
  0x4c   : > { %p1647_p8 = por %p1646_p4, %p1645_p3 }
  0x4d   : > { %p1641_p9 = pneg %p1640_p13 }
  0x4f   : > { %p1648_p5 = pnand %p1647_p8, %p1641_p9 }
  0x51   : > { %1651 = shalt.err (!%p1648_p5)
}
  0x52   : > { %s2377_s11 = smov 32   ;;  %s2378_s22 = smov 512  }
  0x53   : > { %s2379_s5 = sld [smem:[#allocation31_spill]]  ;;  %s1889_s17 = smov [#allocation11]  }
  0x54   : > { %s391_s28 = sshll.u32 %s1889_s17, 4  ;;  %p2380_p6 = pmov %p2376_p10  ;;  %s392_s28 = int_to_ptr.vmem [resolvable:$true] %s391_s28 }
  0x55   : > { %s1663_s26 = scalar_lea.vmem %s392_s28, 2048  ;;  %p1671_p12 = scmp.lt.s32.totalorder %s392_s28, %s392_s28 }
  0x56   : > { %p1664_p1 = scmp.ne.s32.totalorder %s392_s28, %s1663_s26  ;;  %p1672_p3 = scmp.lt.s32.totalorder %s1663_s26, %s1663_s26 }
  0x58   : > { %p1666_p4 = pnand %p1664_p1, %p2380_p6  ;;  %p1673_p9 = por %p1672_p3, %p1671_p12 }
  0x59   : > { %1486 = dma.hbm_to_vmem [thread:$0]  (!%p2017_p11), %s2379_s5, 2048, %s376_s21, [#allocation9], %s2378_s22, %s2378_s22, %s2377_s11  }
  0x5a   : > { %p1667_p8 = pneg %p1666_p4 }
  0x5c   : > { %p1674_p0 = pnand %p1673_p9, %p1667_p8 }
  0x5e   : > { %1677 = shalt.err (!%p1674_p0)
}
  0x5f   : > { %1489 = dma.hbm_to_vmem [thread:$0]  (!%p2017_p11), %s2330_s7, 2048, %s392_s28, [#allocation12], %s2378_s22, %s2378_s22, %s2377_s11  }
  0x60   : > { %s418_s12 = scalar_lea.hbm %s2323_s0, %s2056_s16  ;;  %s412_s15 = scalar_lea.vmem [#allocation2], %s2053_s29 }
  0x61   : > { %s420_s17 = sshll.u32 %s412_s15, 4  ;;  %s2381_s26 = sand.u32 1, %s1870_s19   ;;  %s421_s17 = int_to_ptr.vmem [resolvable:$true] %s420_s17 }
  0x62   : > { %s409_s30 = scalar_lea.sflag [#allocation3], %s2381_s26  ;;  %s1691_s1 = scalar_lea.vmem %s421_s17, 128 }
  0x63   : > { %p1692_p7 = scmp.ne.s32.totalorder %s421_s17, %s1691_s1  ;;  %p2382_p10 = pneg %p2061_p2 }
  0x64   : > { %s1890_s21 = smov [#allocation2]  }
  0x65   : > { %p1694_p13 = pnand %p1692_p7, %p2382_p10  ;;  %s1696_s13 = sshll.u32 %s1890_s21, 4  ;;  %s1697_s13 = int_to_ptr.vmem [resolvable:$false] %s1696_s13 }
  0x66   : > { %s1698_s5 = scalar_lea.vmem %s1697_s13, 256  ;;  %p1699_p11 = scmp.lt.s32.totalorder %s421_s17, %s1697_s13 }
  0x67   : > { %p1695_p5 = pneg %p1694_p13  ;;  %p1700_p1 = scmp.lt.s32.totalorder %s1698_s5, %s1691_s1 }
  0x69   : > { %p1701_p6 = por %p1700_p1, %p1699_p11 }
  0x6b   : > { %p1702_p4 = pnand %p1701_p6, %p1695_p5 }
  0x6d   : > { %1705 = shalt.err (!%p1702_p4)
}
  0x6e   : > { %1493 = dma.hbm_to_vmem [thread:$0]  (!%p2061_p2), %s418_s12, 128, %s421_s17, %s409_s30  }
  0x6f   : > { %s456_s28 = scalar_lea.hbm %s2325_s2, %s2056_s16  ;;  %s450_s3 = scalar_lea.vmem [#allocation7], %s2053_s29 }
  0x70   : > { %s458_s8 = sshll.u32 %s450_s3, 4  ;;  %p2383_p12 = pmov %p2382_p10  ;;  %s459_s8 = int_to_ptr.vmem [resolvable:$true] %s458_s8 }
  0x71   : > { %s1719_s15 = scalar_lea.vmem %s459_s8, 128  ;;  %s1891_s1 = smov [#allocation7]  }
  0x72   : > { %p1720_p8 = scmp.ne.s32.totalorder %s459_s8, %s1719_s15  ;;  %s1724_s5 = sshll.u32 %s1891_s1, 4  ;;  %s1725_s5 = int_to_ptr.vmem [resolvable:$false] %s1724_s5 }
  0x73   : > { %s1726_s26 = scalar_lea.vmem %s1725_s5, 256  ;;  %p1727_p0 = scmp.lt.s32.totalorder %s459_s8, %s1725_s5 }
  0x74   : > { %p1722_p3 = pnand %p1720_p8, %p2383_p12  ;;  %p1728_p7 = scmp.lt.s32.totalorder %s1726_s26, %s1719_s15 }
  0x76   : > { %p1723_p9 = pneg %p1722_p3  ;;  %p1729_p10 = por %p1728_p7, %p1727_p0 }
  0x78   : > { %p1730_p13 = pnand %p1729_p10, %p1723_p9 }
  0x7a   : > { %1733 = shalt.err (!%p1730_p13)
}
  0x7b   : > { %1499 = dma.hbm_to_vmem [thread:$0]  (!%p2061_p2), %s456_s28, 128, %s459_s8, %s2071_s10  }
  0x7c   : > { %p2384_p5 = scmp.ne.s32.totalorder %s2367_s27, 0 }
  0x7d   : > { %s2129_s29 = sand.u32 (!%p2384_p5), 1, %s1866_s18   ;;  %p2385_p11 = scmp.ne.s32.totalorder (!%p2384_p5), %s2364_s25, 0 }
  0x7e   : > { %467 = sbr.rel (%p2384_p5) target bundleno = 412 (0x19c), region = 56  ;;  %s2132_s16 = sshll.u32 (!%p2384_p5), %s2129_s29, 3 }
  0x7f   : > { %s470_s12 = scalar_lea.sflag (!%p2384_p5), [#allocation3], %s2129_s29  ;;  %s473_s17 = scalar_lea.vmem (!%p2384_p5), [#allocation2], %s2132_s16 }
  0x83   : > { %1837 = dma.done.wait (%p2385_p11), %s470_s12, 128  }
  0x84   : > { %1839 = vsyncadd (%p2385_p11), %s470_s12, 4294967168  ;;  %s478_s10 = sand.u32 1, %s1987_s23   ;;  %s482_s14 = scalar_lea.vmem [#allocation5], %s2132_s16 }
  0x85   : > { %s479_s27 = scalar_lea.sflag [#allocation6], %s478_s10 }
  0x86   : > { %1841 = dma.done.wait (%p2385_p11), %s479_s27, 256  }
  0x87   : > { %1843 = vsyncadd (%p2385_p11), %s479_s27, 4294967040  ;;  %s491_s30 = scalar_lea.vmem [#allocation7], %s2132_s16  ;;  %p2386_p2 = scmp.eq.s32.totalorder %s1987_s23, 0 }
  0x89   : > { %1845 = dma.done.wait (%p2386_p2), [#allocation9], 4096   ;;  %p2387_p1 = pmov %p2386_p2 }
  0x8b   : > { %1847 = vsyncadd (%p2387_p1), [#allocation9], 4294963200  ;;  %p2388_p6 = pmov %p2387_p1 }
  0x8c   : > { %p2389_p4 = pmov %p2387_p1 }
  0x8d   : > { %1849 = dma.done.wait (%p2388_p6), [#allocation12], 2048  }
  0x8e   : > { %1851 = vsyncadd (%p2389_p4), [#allocation12], 4294965248  ;;  %v1892_v0 = vmov 0.0   ;;  %v576_v1 = vld [vmem:[#allocation8 + $0x68] sm:$0xff]  ;;  %v578_v2 = vld [vmem:[#allocation8 + $0x78] sm:$0xff]  ;;  %vm601_vm0 = vcmask 261120   ;;  %v581_v52 = vlaneseq }
  0x8f   : > { %669 = vmatprep.mubr.f32.mxu0 %v1892_v0  ;;  %740 = vmatprep.mubr.f32.mxu1 %v1892_v0  ;;  %v575_v3 = vld [vmem:[#allocation8 + $0x60] sm:$0xff]  ;;  %v577_v4 = vld [vmem:[#allocation8 + $0x70] sm:$0xff]  ;;  %v572_v5 = vld [vmem:[#allocation8 + $0x48] sm:$0xff]  ;;  %s2189_s13 = sshll.u32 %s2129_s29, 5  ;;  %s2194_s11 = sshll.u32 %s1874_s20, 9 }
  0x90   : > { %629 = vmatprep.subr.mxu0 %v576_v1  ;;  %700 = vmatprep.subr.mxu1 %v578_v2  ;;  %v574_v6 = vld [vmem:[#allocation8 + $0x58] sm:$0xff]  ;;  %v571_v7 = vld [vmem:[#allocation8 + $0x40] sm:$0xff]  ;;  %v573_v8 = vld [vmem:[#allocation8 + $0x50] sm:$0xff]  ;;  %v582_v53 = vshrl.u32 %v581_v52, 7  ;;  %s547_s22 = scalar_lea.vmem [#allocation13], %s2189_s13  ;;  %s2204_s1 = scalar_lea.hbm %s2332_s9, %s2194_s11 }
  0x91   : > { %630 = vmatpush1.msra.mxu0 %v575_v3  ;;  %701 = vmatpush1.msra.mxu1 %v577_v4  ;;  %v568_v9 = vld [vmem:[#allocation8 + $0x28] sm:$0xff]  ;;  %v570_v10 = vld [vmem:[#allocation8 + $0x38] sm:$0xff]  ;;  %v567_v11 = vld [vmem:[#allocation8 + $0x20] sm:$0xff]  ;;  %s1158_s28 = sshll.u32 %s547_s22, 4  ;;  %s1132_s5 = scalar_lea.sflag [#allocation4], %s2129_s29  ;;  %s2206_s28 = int_to_ptr.vmem [resolvable:$true] %s1158_s28 }
  0x92   : > { %631 = vmatprep.subr.mxu0 %v572_v5  ;;  %702 = vmatprep.subr.mxu1 %v574_v6  ;;  %v569_v12 = vld [vmem:[#allocation8 + $0x30] sm:$0xff]  ;;  %v564_v13 = vld [vmem:[#allocation8 + $0x8] sm:$0xff]  ;;  %v566_v14 = vld [vmem:[#allocation8 + $0x18] sm:$0xff]  ;;  %v2175_v54 = vsub.s32 0, %v582_v53  ;;  %v2177_v55 = vsub.s32 2, %v582_v53  ;;  %v2182_v57 = vsub.s32 1, %v582_v53 }
  0x93   : > { %632 = vmatpush1.msra.mxu0 %v571_v7  ;;  %703 = vmatpush1.msra.mxu1 %v573_v8  ;;  %v563_v15 = vld [vmem:[#allocation8] sm:$0xff]  ;;  %v565_v16 = vld [vmem:[#allocation8 + $0x10] sm:$0xff]  ;;  %v769_v18 = vld [vmem:[#allocation10 + $0x68] sm:$0xff]  ;;  %v2184_v58 = vsub.s32 3, %v582_v53  ;;  %s1734_s26 = scalar_lea.vmem %s2206_s28, 512  ;;  %p2390_p12 = scmp.ne.s32.totalorder %s2372_s24, 0 }
  0x94   : > { %633 = vmatprep.subr.mxu0 %v568_v9  ;;  %704 = vmatprep.subr.mxu1 %v570_v10  ;;  %v562_v17 = vld [vmem:[%s473_s17] sm:$0xff]  ;;  %v768_v20 = vld [vmem:[#allocation10 + $0x60] sm:$0xff]  ;;  %v765_v22 = vld [vmem:[#allocation10 + $0x48] sm:$0xff]  ;;  %p1735_p8 = scmp.ne.s32.totalorder %s2206_s28, %s1734_s26  ;;  %s1893_s16 = smov [#allocation13]  }
  0x95   : > { %634 = vmatpush1.msra.mxu0 %v567_v11  ;;  %705 = vmatpush1.msra.mxu1 %v569_v12  ;;  %v771_v19 = vld [vmem:[#allocation10 + $0x78] sm:$0xff]  ;;  %v770_v21 = vld [vmem:[#allocation10 + $0x70] sm:$0xff]  ;;  %v764_v24 = vld [vmem:[#allocation10 + $0x40] sm:$0xff]  ;;  %s1738_s12 = sshll.u32 %s1893_s16, 4  ;;  %s1739_s12 = int_to_ptr.vmem [resolvable:$false] %s1738_s12 }
  0x96   : > { %635 = vmatprep.subr.mxu0 %v564_v13  ;;  %706 = vmatprep.subr.mxu1 %v566_v14  ;;  %v767_v23 = vld [vmem:[#allocation10 + $0x58] sm:$0xff]  ;;  %v766_v25 = vld [vmem:[#allocation10 + $0x50] sm:$0xff]  ;;  %v761_v26 = vld [vmem:[#allocation10 + $0x28] sm:$0xff]  ;;  %p1736_p3 = pnand %p1735_p8, %p2390_p12  ;;  %s1740_s17 = scalar_lea.vmem %s1739_s12, 1024 }
  0x97   : > { %636 = vmatpush1.msra.mxu0 %v563_v15  ;;  %707 = vmatpush1.msra.mxu1 %v565_v16  ;;  %v763_v27 = vld [vmem:[#allocation10 + $0x38] sm:$0xff]  ;;  %v760_v28 = vld [vmem:[#allocation10 + $0x20] sm:$0xff]  ;;  %v762_v29 = vld [vmem:[#allocation10 + $0x30] sm:$0xff]  ;;  %p1741_p0 = scmp.lt.s32.totalorder %s2206_s28, %s1739_s12  ;;  %p1742_p7 = scmp.lt.s32.totalorder %s1740_s17, %s1734_s26 }
  0x98   : > { %1436 = vmatmul.mubr.msk.f32.vlgmr.msra.gmra.mxu0 %vm601_vm0, %v562_v17  ;;  %1437 = vmatmul.mubr.msk.f32.vlgmr.msra.gmra.mxu1 %vm601_vm0, %v562_v17  ;;  %v757_v30 = vld [vmem:[#allocation10 + $0x8] sm:$0xff]  ;;  %v759_v31 = vld [vmem:[#allocation10 + $0x18] sm:$0xff]  ;;  %v756_v32 = vld [vmem:[#allocation10] sm:$0xff]  ;;  %p1737_p9 = pneg %p1736_p3 }
  0x99   : > { %821 = vmatprep.subr.mxu0 %v769_v18  ;;  %892 = vmatprep.subr.mxu1 %v771_v19  ;;  %v758_v33 = vld [vmem:[#allocation10 + $0x10] sm:$0xff]  ;;  %v755_v34 = vld [vmem:[%s482_s14] sm:$0xff]  ;;  %v959_v36 = vld [vmem:[#allocation11 + $0x78] sm:$0xff]  ;;  %p1743_p10 = por %p1742_p7, %p1741_p0 }
  0x9a   : > { %822 = vmatpush1.msra.mxu0 %v768_v20  ;;  %893 = vmatpush1.msra.mxu1 %v770_v21  ;;  %v957_v35 = vld [vmem:[#allocation11 + $0x68] sm:$0xff]  ;;  %v956_v37 = vld [vmem:[#allocation11 + $0x60] sm:$0xff]  ;;  %v958_v38 = vld [vmem:[#allocation11 + $0x70] sm:$0xff] }
  0x9b   : > { %823 = vmatprep.subr.mxu0 %v765_v22  ;;  %894 = vmatprep.subr.mxu1 %v767_v23  ;;  %v953_v39 = vld [vmem:[#allocation11 + $0x48] sm:$0xff]  ;;  %v955_v40 = vld [vmem:[#allocation11 + $0x58] sm:$0xff]  ;;  %v952_v41 = vld [vmem:[#allocation11 + $0x40] sm:$0xff]  ;;  %p1744_p13 = pnand %p1743_p10, %p1737_p9 }
  0x9c   : > { %824 = vmatpush1.msra.mxu0 %v764_v24  ;;  %895 = vmatpush1.msra.mxu1 %v766_v25  ;;  %v954_v42 = vld [vmem:[#allocation11 + $0x50] sm:$0xff]  ;;  %v949_v43 = vld [vmem:[#allocation11 + $0x28] sm:$0xff]  ;;  %v951_v44 = vld [vmem:[#allocation11 + $0x38] sm:$0xff] }
  0x9d   : > { %825 = vmatprep.subr.mxu0 %v761_v26  ;;  %896 = vmatprep.subr.mxu1 %v763_v27  ;;  %v948_v45 = vld [vmem:[#allocation11 + $0x20] sm:$0xff]  ;;  %v950_v46 = vld [vmem:[#allocation11 + $0x30] sm:$0xff]  ;;  %v945_v47 = vld [vmem:[#allocation11 + $0x8] sm:$0xff] }
  0x9e   : > { %826 = vmatpush1.msra.mxu0 %v760_v28  ;;  %897 = vmatpush1.msra.mxu1 %v762_v29  ;;  %v947_v48 = vld [vmem:[#allocation11 + $0x18] sm:$0xff]  ;;  %v944_v49 = vld [vmem:[#allocation11] sm:$0xff]  ;;  %v946_v50 = vld [vmem:[#allocation11 + $0x10] sm:$0xff] }
  0x9f   : > { %827 = vmatprep.subr.mxu0 %v757_v30  ;;  %898 = vmatprep.subr.mxu1 %v759_v31  ;;  %v943_v51 = vld [vmem:[%s491_s30] sm:$0xff] }
  0xa0   : > { %828 = vmatpush1.msra.mxu0 %v756_v32  ;;  %861 = vmatprep.mubr.f32.mxu0 %v1892_v0  ;;  %v579_v56 = vld [vmem:[%s2327_s4] sm:$0xf] }
  0xa1   : > { %899 = vmatpush1.msra.mxu1 %v758_v33  ;;  %932 = vmatprep.mubr.f32.mxu1 %v1892_v0  ;;  %v584_v59 = vrot.slane %v579_v56, %v2175_v54  ;;  %v592_v60 = vrot.slane %v579_v56, %v2177_v55  ;;  %v588_v61 = vrot.slane %v579_v56, %v2182_v57  ;;  %v772_v9 = vld [vmem:[%s2329_s6] sm:$0xf] }
  0xa2   : > { %1438 = vmatmul.mubr.msk.f32.vlgmr.msra.gmra.mxu0 %vm601_vm0, %v755_v34  ;;  %1439 = vmatmul.mubr.msk.f32.vlgmr.msra.gmra.mxu1 %vm601_vm0, %v755_v34  ;;  %v596_v62 = vrot.slane %v579_v56, %v2184_v58  ;;  %v777_v12 = vrot.slane %v772_v9, %v2175_v54  ;;  %v785_v13 = vrot.slane %v772_v9, %v2177_v55 }
  0xa3   : > { %1009 = vmatprep.subr.mxu0 %v957_v35  ;;  %1080 = vmatprep.subr.mxu1 %v959_v36 }
  0xa4   : > { %1010 = vmatpush1.msra.mxu0 %v956_v37  ;;  %1081 = vmatpush1.msra.mxu1 %v958_v38 }
  0xa5   : > { %1011 = vmatprep.subr.mxu0 %v953_v39  ;;  %1082 = vmatprep.subr.mxu1 %v955_v40 }
  0xa6   : > { %1012 = vmatpush1.msra.mxu0 %v952_v41  ;;  %1083 = vmatpush1.msra.mxu1 %v954_v42 }
  0xa7   : > { %1013 = vmatprep.subr.mxu0 %v949_v43  ;;  %1084 = vmatprep.subr.mxu1 %v951_v44 }
  0xa8   : > { %1014 = vmatpush1.msra.mxu0 %v948_v45  ;;  %1085 = vmatpush1.msra.mxu1 %v950_v46 }
  0xa9   : > { %1015 = vmatprep.subr.mxu0 %v945_v47  ;;  %1086 = vmatprep.subr.mxu1 %v947_v48 }
  0xaa   : > { %1016 = vmatpush1.msra.mxu0 %v944_v49  ;;  %1049 = vmatprep.mubr.f32.mxu0 %v1892_v0 }
  0xab   : > { %1087 = vmatpush1.msra.mxu1 %v946_v50  ;;  %1120 = vmatprep.mubr.f32.mxu1 %v1892_v0 }
  0xac   : > { %1440 = vmatmul.mubr.msk.f32.vlgmr.msra.gmra.mxu0 %vm601_vm0, %v943_v51  ;;  %1441 = vmatmul.mubr.msk.f32.vlgmr.msra.gmra.mxu1 %vm601_vm0, %v943_v51 }
 0x158   : > { %v671_v63 = vpop.f32.mrf.mxu0  ;;  %v742_v0 = vpop.f32.mrf.mxu1 }
 0x159   : > { %v672_v1 = vadd.f32 %v671_v63, %v584_v59  ;;  %v743_v2 = vadd.f32 %v742_v0, %v592_v60 }
 0x15a   : > { %v673_v3 = vpop.f32.mrf.mxu0  ;;  %v744_v4 = vpop.f32.mrf.mxu1 }
 0x15b   : > { %v747_v5 = vmul.f32 0.35355338, %v672_v1  ;;  %v749_v6 = vmul.f32 0.35355338, %v743_v2  ;;  %v674_v7 = vadd.f32 %v673_v3, %v588_v61  ;;  %v745_v8 = vadd.f32 %v744_v4, %v596_v62 }
 0x15d   : > { %751 = vst [vmem:[%s547_s22] sm:$0xff] %v747_v5  ;;  %753 = vst [vmem:[%s547_s22 + $0x10] sm:$0xff] %v749_v6  ;;  %v748_v10 = vmul.f32 0.35355338, %v674_v7  ;;  %v750_v11 = vmul.f32 0.35355338, %v745_v8 }
 0x15f   : > { %752 = vst [vmem:[%s547_s22 + $0x8] sm:$0xff] %v748_v10  ;;  %754 = vst [vmem:[%s547_s22 + $0x18] sm:$0xff] %v750_v11 }
 0x160   : > { %1747 = shalt.err (!%p1744_p13)
}
 0x161   : > { %s1748_s27 = scalar_lea.hbm %s2204_s1, 512  ;;  %s1752_s30 = scalar_lea.hbm %s2332_s9, 1024 }
 0x162   : > { %p1749_p5 = scmp.ne.s32.totalorder %s2204_s1, %s1748_s27  ;;  %p1753_p1 = scmp.lt.s32.totalorder %s2204_s1, %s2332_s9 }
 0x163   : > { %p1754_p6 = scmp.lt.s32.totalorder %s1752_s30, %s1748_s27 }
 0x164   : > { %p1750_p11 = pnand %p1749_p5, %p2390_p12 }
 0x165   : > { %p1755_p4 = por %p1754_p6, %p1753_p1 }
 0x166   : > { %p1751_p2 = pneg %p1750_p11 }
 0x168   : > { %p1756_p8 = pnand %p1755_p4, %p1751_p2 }
 0x16a   : > { %1759 = shalt.err (!%p1756_p8)
}
 0x16b   : > { %1474 = dma.vmem_to_hbm [thread:$0]  (%p2390_p12), %s2206_s28, 512, %s2204_s1, %s1132_s5   ;;  %v781_v14 = vrot.slane %v772_v9, %v2182_v57  ;;  %v789_v15 = vrot.slane %v772_v9, %v2184_v58  ;;  %v863_v16 = vpop.f32.mrf.mxu0  ;;  %v934_v17 = vpop.f32.mrf.mxu1 }
 0x16c   : > { %s554_s22 = scalar_lea.vmem [#allocation14], %s2189_s13  ;;  %v864_v18 = vadd.f32 %v863_v16, %v777_v12  ;;  %v935_v19 = vadd.f32 %v934_v17, %v785_v13  ;;  %s2391_s15 = sld [smem:[#allocation33_spill]] }
 0x16d   : > { %s1174_s3 = sshll.u32 %s554_s22, 4  ;;  %v865_v20 = vpop.f32.mrf.mxu0  ;;  %v936_v21 = vpop.f32.mrf.mxu1  ;;  %s2392_s26 = sld [smem:[#allocation32_spill]]  ;;  %s2240_s3 = int_to_ptr.vmem [resolvable:$true] %s1174_s3 }
 0x16e   : > { %939 = vst [vmem:[%s554_s22] sm:$0xff] %v864_v18  ;;  %941 = vst [vmem:[%s554_s22 + $0x10] sm:$0xff] %v935_v19  ;;  %v866_v22 = vadd.f32 %v865_v20, %v781_v14  ;;  %v937_v23 = vadd.f32 %v936_v21, %v789_v15  ;;  %s2247_s16 = scalar_lea.sflag [#allocation15], %s478_s10  ;;  %s1760_s12 = scalar_lea.vmem %s2240_s3, 512 }
 0x16f   : > { %p1761_p3 = scmp.ne.s32.totalorder %s2240_s3, %s1760_s12  ;;  %s1894_s17 = smov [#allocation14]  }
 0x170   : > { %940 = vst [vmem:[%s554_s22 + $0x8] sm:$0xff] %v866_v22  ;;  %942 = vst [vmem:[%s554_s22 + $0x18] sm:$0xff] %v937_v23  ;;  %s1764_s27 = sshll.u32 %s1894_s17, 4  ;;  %s1765_s27 = int_to_ptr.vmem [resolvable:$false] %s1764_s27 }
 0x171   : > { %p1762_p9 = pnand %p1761_p3, %p2390_p12  ;;  %s1766_s29 = scalar_lea.vmem %s1765_s27, 1024 }
 0x172   : > { %s2238_s20 = scalar_lea.hbm %s2391_s15, %s2194_s11  ;;  %p1767_p7 = scmp.lt.s32.totalorder %s2240_s3, %s1765_s27 }
 0x173   : > { %v960_v24 = vld [vmem:[%s2392_s26] sm:$0xf]  ;;  %p1763_p0 = pneg %p1762_p9  ;;  %p1768_p10 = scmp.lt.s32.totalorder %s1766_s29, %s1760_s12 }
 0x175   : > { %p1769_p13 = por %p1768_p10, %p1767_p7 }
 0x177   : > { %p1770_p5 = pnand %p1769_p13, %p1763_p0 }
 0x179   : > { %1773 = shalt.err (!%p1770_p5)
}
 0x17a   : > { %s1774_s23 = scalar_lea.hbm %s2238_s20, 512  ;;  %s1778_s30 = scalar_lea.hbm %s2391_s15, 1024 }
 0x17b   : > { %p1775_p11 = scmp.ne.s32.totalorder %s2238_s20, %s1774_s23  ;;  %p1779_p6 = scmp.lt.s32.totalorder %s2238_s20, %s2391_s15 }
 0x17c   : > { %p1780_p4 = scmp.lt.s32.totalorder %s1778_s30, %s1774_s23 }
 0x17d   : > { %p1776_p2 = pnand %p1775_p11, %p2390_p12 }
 0x17e   : > { %p1781_p8 = por %p1780_p4, %p1779_p6 }
 0x17f   : > { %p1777_p1 = pneg %p1776_p2 }
 0x181   : > { %p1782_p3 = pnand %p1781_p8, %p1777_p1 }
 0x183   : > { %1785 = shalt.err (!%p1782_p3)
}
 0x184   : > { %1475 = dma.vmem_to_hbm [thread:$0]  (%p2390_p12), %s2240_s3, 512, %s2238_s20, %s2247_s16   ;;  %v965_v25 = vrot.slane %v960_v24, %v2175_v54  ;;  %v973_v26 = vrot.slane %v960_v24, %v2177_v55  ;;  %v969_v27 = vrot.slane %v960_v24, %v2182_v57  ;;  %v977_v28 = vrot.slane %v960_v24, %v2184_v58  ;;  %v1051_v29 = vpop.f32.mrf.mxu0  ;;  %v1122_v30 = vpop.f32.mrf.mxu1 }
 0x185   : > { %s561_s22 = scalar_lea.vmem [#allocation16], %s2189_s13  ;;  %s2393_s20 = sld [smem:[#allocation34_spill]] }
 0x186   : > { %s1190_s8 = sshll.u32 %s561_s22, 4  ;;  %v1052_v31 = vadd.f32 %v1051_v29, %v965_v25  ;;  %v1123_v32 = vadd.f32 %v1122_v30, %v973_v26  ;;  %v1053_v33 = vpop.f32.mrf.mxu0  ;;  %v1124_v34 = vpop.f32.mrf.mxu1  ;;  %s1895_s26 = smov [#allocation16]   ;;  %s2275_s8 = int_to_ptr.vmem [resolvable:$true] %s1190_s8 }
 0x187   : > { %v1054_v35 = vadd.f32 %v1053_v33, %v969_v27  ;;  %v1125_v36 = vadd.f32 %v1124_v34, %v977_v28  ;;  %s1786_s5 = scalar_lea.vmem %s2275_s8, 512  ;;  %s1790_s12 = sshll.u32 %s1895_s26, 4  ;;  %s1791_s12 = int_to_ptr.vmem [resolvable:$false] %s1790_s12 }
 0x188   : > { %1127 = vst [vmem:[%s561_s22] sm:$0xff] %v1052_v31  ;;  %1129 = vst [vmem:[%s561_s22 + $0x10] sm:$0xff] %v1123_v32  ;;  %p1787_p9 = scmp.ne.s32.totalorder %s2275_s8, %s1786_s5  ;;  %s1792_s17 = scalar_lea.vmem %s1791_s12, 1024 }
 0x189   : > { %1128 = vst [vmem:[%s561_s22 + $0x8] sm:$0xff] %v1054_v35  ;;  %1130 = vst [vmem:[%s561_s22 + $0x18] sm:$0xff] %v1125_v36  ;;  %p1793_p10 = scmp.lt.s32.totalorder %s2275_s8, %s1791_s12  ;;  %p1794_p13 = scmp.lt.s32.totalorder %s1792_s17, %s1786_s5 }
 0x18a   : > { %p1788_p0 = pnand %p1787_p9, %p2390_p12 }
 0x18b   : > { %s2394_s1 = smov %s2393_s20  ;;  %s1188_s13 = scalar_lea.hbm %s2393_s20, %s2194_s11 }
 0x18c   : > { %p1789_p7 = pneg %p1788_p0  ;;  %p1795_p5 = por %p1794_p13, %p1793_p10 }
 0x18e   : > { %p1796_p11 = pnand %p1795_p5, %p1789_p7 }
 0x190   : > { %1799 = shalt.err (!%p1796_p11)
}
 0x191   : > { %s1800_s27 = scalar_lea.hbm %s1188_s13, 512  ;;  %s1804_s23 = scalar_lea.hbm %s2394_s1, 1024 }
 0x192   : > { %p1801_p2 = scmp.ne.s32.totalorder %s1188_s13, %s1800_s27  ;;  %p1805_p4 = scmp.lt.s32.totalorder %s1188_s13, %s2394_s1 }
 0x193   : > { %p1806_p8 = scmp.lt.s32.totalorder %s1804_s23, %s1800_s27 }
 0x194   : > { %p1802_p1 = pnand %p1801_p2, %p2390_p12 }
 0x195   : > { %p1807_p3 = por %p1806_p8, %p1805_p4 }
 0x196   : > { %p1803_p6 = pneg %p1802_p1 }
 0x198   : > { %p1808_p9 = pnand %p1807_p3, %p1803_p6 }
 0x19a   : > { %1811 = shalt.err (!%p1808_p9)
}
 0x19b   : > { %1476 = dma.vmem_to_hbm [thread:$0]  (%p2390_p12), %s2275_s8, 512, %s1188_s13, %s2247_s16  }
 0x19c PF: > { %s2395_s30 = sld [smem:[#allocation23_spill]] }
 0x19d   : > { %s2396_s25 = sld [smem:[#allocation26_spill]] }
 0x19e   : > { %s2397_s21 = sld [smem:[#allocation25_spill]] }
 0x1a2   : > { %s1202_s22 = sand.u32 1, %s2395_s30  }
 0x1a3   : > { %p2398_p0 = scmp.ne.s32.totalorder %s2396_s25, 0  ;;  %s1203_s3 = scalar_lea.sflag [#allocation4], %s1202_s22 }
 0x1a4   : > { %p2399_p7 = scmp.ge.s32.totalorder %s2397_s21, 2 }
 0x1a6   : > { %p1501_p10 = pnand %p2399_p7, %p2398_p0 }
 0x1a8   : > { %p1502_p13 = pneg %p1501_p10 }
 0x1aa   : > { %1853 = dma.done.wait (%p1502_p13), %s1203_s3, 512  }
 0x1ab   : > { %1855 = vsyncadd (%p1502_p13), %s1203_s3, 4294966784  ;;  %s2400_s28 = sadd.s32 4294967294, %s2397_s21  }
 0x1ac   : > { %s1211_s20 = sand.u32 1, %s2400_s28  }
 0x1ad   : > { %s1212_s5 = scalar_lea.sflag [#allocation15], %s1211_s20 }
 0x1ae   : > { %1857 = dma.done.wait (%p1502_p13), %s1212_s5, 1024  }
 0x1af   : > { %1859 = vsyncadd (%p1502_p13), %s1212_s5, 4294966272  ;;  %s36_s22 = sadd.s32 1, %s2397_s21   ;;  %s2401_s24 = sld [smem:[#allocation28_spill]] }
 0x1b0   : > { %p33_p12 = scmp.ge.s32.totalorder %s36_s22, 4   ;;  %s2402_s20 = sld [smem:[#allocation24_spill]] }
 0x1b1   : > { %s2403_s21 = sld [smem:[#allocation27_spill]]  ;;  %s2404_s17 = smov %s1866_s18 }
 0x1b2   : > { %s2405_s18 = smov %s1870_s19  ;;  %35 = sbr.rel (!%p33_p12) target bundleno = 19 (0x13), region = 169 }
 0x1b5   : > { %s2406_s19 = smov %s2401_s24 }
 0x1b7   :  { %1226 = vsyncpa [#allocation3], 1 }
 0x1b8   :  { %1228 = vsyncpa [#allocation3 + $0x1], 1 }
 0x1b9   :  { %1229 = vsyncpa [#allocation6], 1 }
 0x1ba   :  { %1231 = vsyncpa [#allocation6 + $0x1], 1 }
 0x1bb   :  { %1232 = vsyncpa [#allocation9], 1 }
 0x1bc   :  { %1233 = vsyncpa [#allocation12], 1 }
 0x1bd   :  { %1234 = vsyncpa [#allocation4], 1 }
 0x1be   :  { %1236 = vsyncpa [#allocation4 + $0x1], 1 }
 0x1bf   :  { %1237 = vsyncpa [#allocation15], 1 }
 0x1c0   :  { %1239 = vsyncpa [#allocation15 + $0x1], 1 }

</bundles_post_ra>
